<compile_context>
chip_gen: v5e
topology: v5e:2x2
jax: 0.10.0
libtpu: 0.0.40
codegen_flags: <defaults>
</compile_context>

<pallas_src>
import jax
import jax.numpy as jnp
from jax.experimental import pallas as pl
from jax.experimental.pallas import tpu as pltpu

_MiB = 1024 * 1024


def _round_up(x: int, m: int) -> int:
    return ((x + m - 1) // m) * m


def _cdiv(a: int, b: int) -> int:
    return -(-a // b)


def _tpu_generation_info():
    """Best-effort (vmem_capacity_bytes, batch-tile ceiling, tensorcores/chip)."""
    kind = ""
    try:
        kind = jax.devices()[0].device_kind.lower()
    except Exception:
        pass
    vmem_cap = 128 * _MiB
    try:
        vmem_cap = int(pltpu.get_tpu_info().vmem_capacity_bytes)
    except Exception:
        if "v7" in kind:
            vmem_cap = 64 * _MiB
    if ("v5e" in kind) or ("v5 lite" in kind) or ("v5lite" in kind):
        tile_cap, num_tc = 128, 1      # single vector-store slot: keep f32 hidden tile small
    elif "v7" in kind:
        tile_cap, num_tc = 256, 2      # 64 MiB VMEM, 2 TensorCores per chip
    elif "v6" in kind:
        tile_cap, num_tc = 512, 1      # 128 MiB VMEM, extra store slot
    else:
        tile_cap, num_tc = 256, 1
    return vmem_cap, tile_cap, num_tc


def _soft_vmem_cap(vmem_cap: int) -> int:
    # Leave headroom for Mosaic internal scratch / spill: ~32 MiB on v7x, ~96 MiB on v5e/v6e.
    return max(vmem_cap // 2, vmem_cap - 32 * _MiB)


def prepare_policy_head_params(w1, b1, w2, b2, *, compute_dtype=jnp.float32):
    """One-time transpose + zero-pad of PyTorch-convention (out, in) Linear weights.

    Call once per parameter set and reuse the result; policy_head_forward then only
    touches activations per call. Zero padding is exact: padded x columns hit zero
    w1^T rows, padded hidden units get zero bias (relu(0)=0) and zero w2^T rows.
    Set compute_dtype=jnp.bfloat16 for single-pass MXU on v6e/v7x (f32 accumulation;
    results differ slightly from the f32 reference).
    """
    H, D_in = w1.shape
    A = w2.shape[0]
    cdt = jnp.dtype(compute_dtype)

    H_pad = _round_up(H, 128)
    A_pad = _round_up(A, 128)
    D_128 = _round_up(D_in, 128)

    # Decide whether w1^T can stay VMEM-resident; otherwise pick a K (= D_in) tile.
    vmem_cap, _, _ = _tpu_generation_info()
    soft_cap = _soft_vmem_cap(vmem_cap)
    w_item = cdt.itemsize
    w2_bytes = H_pad * A_pad * w_item
    w1_budget = max(128 * H_pad * w_item, soft_cap // 2 - 2 * w2_bytes)
    if D_128 * H_pad * w_item <= w1_budget:
        tile_k, k_tiles, D_pad = D_128, 1, D_128
    else:
        rows = max(128, ((w1_budget // 2) // (H_pad * w_item)) // 128 * 128)
        k_tiles = _cdiv(D_128, rows)
        tile_k = _round_up(_cdiv(D_128, k_tiles), 128)
        k_tiles = _cdiv(D_128, tile_k)
        D_pad = tile_k * k_tiles

    w1t = jnp.zeros((D_pad, H_pad), cdt).at[:D_in, :H].set(w1.T.astype(cdt))
    w2t = jnp.zeros((H_pad, A_pad), cdt).at[:H, :A].set(w2.T.astype(cdt))
    b1p = jnp.zeros((1, H_pad), jnp.float32).at[0, :H].set(b1.astype(jnp.float32))
    b2p = jnp.zeros((1, A_pad), jnp.float32).at[0, :A].set(b2.astype(jnp.float32))

    return dict(w1t=w1t, b1=b1p, w2t=w2t, b2=b2p,
                D_in=D_in, H=H, A=A,
                D_pad=D_pad, H_pad=H_pad, A_pad=A_pad,
                tile_k=tile_k, k_tiles=k_tiles, compute_dtype=cdt)


def _policy_head_kernel(x_ref, w1_ref, b1_ref, w2_ref, b2_ref, out_ref, h_acc):
    # x:  (TILE_N, TILE_K)   w1^T: (TILE_K, H)   b1: (1, H)  [f32]
    # w2^T: (H, A)           b2: (1, A) [f32]    out: (TILE_N, A)
    # h_acc: (TILE_N, H) f32 scratch accumulator over the K (= D_in) grid axis.
    k = pl.program_id(1)
    part = jnp.dot(x_ref[...], w1_ref[...], preferred_element_type=jnp.float32)

    @pl.when(k == 0)
    def _():
        h_acc[...] = part

    @pl.when(k > 0)
    def _():
        h_acc[...] = h_acc[...] + part

    @pl.when(k == pl.num_programs(1) - 1)
    def _():
        h = jnp.maximum(h_acc[...] + b1_ref[...], 0.0)           # f32 bias + ReLU
        logits = jnp.dot(h.astype(w2_ref.dtype), w2_ref[...],
                         preferred_element_type=jnp.float32)
        out_ref[...] = (logits + b2_ref[...]).astype(out_ref.dtype)


def policy_head_forward(piece_vector, prepared, *, tile_n=None):
    """piece_vector: (N, num_pieces, num_channels) -> (N, action_space_size) float32."""
    N = piece_vector.shape[0]
    x = piece_vector.reshape(N, -1)             # matches torch .view(N, -1) (row-major)
    D_in, A = prepared["D_in"], prepared["A"]
    assert x.shape[1] == D_in, "piece_vector feature size mismatch"
    D_pad, H_pad, A_pad = prepared["D_pad"], prepared["H_pad"], prepared["A_pad"]
    tile_k, k_tiles = prepared["tile_k"], prepared["k_tiles"]
    cdt = prepared["compute_dtype"]
    if x.dtype != cdt:
        x = x.astype(cdt)

    vmem_cap, tile_cap, num_tc = _tpu_generation_info()
    if tile_n is not None:
        tile_cap = tile_n
    soft_cap = _soft_vmem_cap(vmem_cap)

    # Shape the batch tile to N (<= one sublane group of waste per tile) and give
    # each v7x TensorCore at least one tile when the batch is big enough.
    N8 = _round_up(max(N, 1), 8)
    n_tiles = _cdiv(N8, tile_cap)
    if num_tc > 1 and N8 >= 8 * num_tc:
        n_tiles = max(n_tiles, num_tc)
    TILE_N = _round_up(_cdiv(N8, n_tiles), 8)
    N_pad = TILE_N * n_tiles

    # Pad activations only when actually needed (skip the extra HBM copy otherwise).
    if (N_pad != N) or (D_pad != D_in):
        x = jnp.pad(x, ((0, N_pad - N), (0, D_pad - D_in)))

    w_item = cdt.itemsize
    out_bytes = 4
    cost = pl.CostEstimate(
        flops=2 * N_pad * (D_pad * H_pad + H_pad * A_pad),
        transcendentals=0,
        bytes_accessed=int(
            x.size * w_item
            + (D_pad * H_pad + H_pad * A_pad) * w_item * (n_tiles if k_tiles > 1 else 1)
            + (H_pad + A_pad) * 4
            + N_pad * A_pad * out_bytes),
    )

    def _run(single_buffer_resident):
        resident = pl.Buffered(1) if single_buffer_resident else None
        w1_mode = resident if k_tiles == 1 else None    # w1^T streams along K otherwise

        def _spec(shape, imap, mode=None):
            if mode is None:
                return pl.BlockSpec(shape, imap)
            return pl.BlockSpec(shape, imap, pipeline_mode=mode)

        w1_bufs = 1 if (k_tiles == 1 and single_buffer_resident) else 2
        res_bufs = 1 if single_buffer_resident else 2
        footprint = (
            2 * TILE_N * tile_k * w_item                                   # x tiles
            + 2 * TILE_N * A_pad * out_bytes                               # out tiles
            + w1_bufs * tile_k * H_pad * w_item                            # w1^T
            + res_bufs * (H_pad * A_pad * w_item + (H_pad + A_pad) * 4)    # w2^T + biases
            + TILE_N * H_pad * 4)                                          # hidden accumulator
        vmem_limit = int(min(max(footprint + footprint // 4 + 2 * _MiB, 16 * _MiB),
                             soft_cap))

        return pl.pallas_call(
            _policy_head_kernel,
            out_shape=jax.ShapeDtypeStruct((N_pad, A_pad), jnp.float32),
            grid=(n_tiles, k_tiles),
            in_specs=[
                _spec((TILE_N, tile_k), lambda i, k: (i, k)),            # x: tiled over N, K
                _spec((tile_k, H_pad), lambda i, k: (k, 0), w1_mode),    # w1^T
                _spec((1, H_pad), lambda i, k: (0, 0), resident),        # b1 (f32)
                _spec((H_pad, A_pad), lambda i, k: (0, 0), resident),    # w2^T
                _spec((1, A_pad), lambda i, k: (0, 0), resident),        # b2 (f32)
            ],
            out_specs=pl.BlockSpec((TILE_N, A_pad), lambda i, k: (i, 0)),
            scratch_shapes=[pltpu.VMEM((TILE_N, H_pad), jnp.float32)],
            compiler_params=pltpu.CompilerParams(
                dimension_semantics=("parallel", "arbitrary"),
                vmem_limit_bytes=vmem_limit,
            ),
            cost_estimate=cost,
        )(x, prepared["w1t"], prepared["b1"], prepared["w2t"], prepared["b2"])

    try:
        out_p = jax.block_until_ready(_run(True))
    except Exception:
        # Fallback if this JAX/Mosaic build rejects single-buffered resident operands.
        out_p = _run(False)

    return out_p[:N, :A]


def make_params(key, num_pieces, num_channels, action_space_size, policy_hidden_size):
    """Deterministic synthetic parameters with PyTorch nn.Linear shapes (out, in)."""
    d_in = num_pieces * num_channels
    k1, k2, k3, k4 = jax.random.split(key, 4)
    w1 = jax.random.normal(k1, (policy_hidden_size, d_in), jnp.float32) * 0.1
    b1 = jax.random.normal(k2, (policy_hidden_size,), jnp.float32) * 0.1
    w2 = jax.random.normal(k3, (action_space_size, policy_hidden_size), jnp.float32) * 0.1
    b2 = jax.random.normal(k4, (action_space_size,), jnp.float32) * 0.1
    return w1, b1, w2, b2


def _reference(piece_vector, w1, b1, w2, b2):
    x = piece_vector.reshape(piece_vector.shape[0], -1)
    hidden = jnp.maximum(x @ w1.T + b1, 0.0)
    return hidden @ w2.T + b2


if __name__ == "__main__":
    # Small shapes consistent with the module.
    N = 2
    num_pieces = 4
    num_channels = 8
    policy_hidden_size = 32
    action_space_size = 16

    key = jax.random.PRNGKey(0)
    k_x, k_p = jax.random.split(key)
    piece_vector = jax.random.normal(k_x, (N, num_pieces, num_channels), jnp.float32)
    w1, b1, w2, b2 = make_params(k_p, num_pieces, num_channels,
                                 action_space_size, policy_hidden_size)
    ref = _reference(piece_vector, w1, b1, w2, b2)

    # One-time prepare (per-model), then per-call forward (default f32: exact vs reference).
    prep_f32 = prepare_policy_head_params(w1, b1, w2, b2)
    out = jax.block_until_ready(policy_head_forward(piece_vector, prep_f32))
    assert out.shape == (N, action_space_size)
    assert jnp.allclose(out, ref, atol=1e-5, rtol=1e-5)

    # Non-multiple-of-8 batch exercises row padding / final slicing.
    pv2 = jax.random.normal(jax.random.PRNGKey(1), (5, num_pieces, num_channels), jnp.float32)
    out2 = jax.block_until_ready(policy_head_forward(pv2, prep_f32))
    assert jnp.allclose(out2, _reference(pv2, w1, b1, w2, b2), atol=1e-5, rtol=1e-5)

    # Optional bf16 MXU-operand path (f32 accumulation); looser tolerance vs f32 reference.
    prep_bf16 = prepare_policy_head_params(w1, b1, w2, b2, compute_dtype=jnp.bfloat16)
    out_bf16 = jax.block_until_ready(policy_head_forward(piece_vector, prep_bf16))
    assert jnp.allclose(out_bf16, ref, atol=5e-2, rtol=5e-2)

    print("KERNEL_OK")
</pallas_src>

<mosaic_0001>
module attributes {stable_mosaic.version = 11 : i64} {
  func.func @_policy_head_kernel(%arg0: i32, %arg1: i32, %arg2: memref<8x128xf32, #tpu.memory_space<vmem>>, %arg3: memref<128x128xf32, #tpu.memory_space<vmem>>, %arg4: memref<1x128xf32, #tpu.memory_space<vmem>>, %arg5: memref<128x128xf32, #tpu.memory_space<vmem>>, %arg6: memref<1x128xf32, #tpu.memory_space<vmem>>, %arg7: memref<8x128xf32, #tpu.memory_space<vmem>>, %arg8: memref<8x128xf32, #tpu.memory_space<vmem>>) attributes {dimension_semantics = [#tpu.dimension_semantics<parallel>, #tpu.dimension_semantics<arbitrary>], iteration_bounds = array<i64: 1, 1>, scalar_prefetch = 0 : i64, scratch_operands = 1 : i64, tpu.core_type = #tpu.core_type<tc>, window_params = [{transform_indices = @transform_0, window_bounds = array<i64: 8, 128>}, {pipeline_mode = #tpu.pipeline_mode<synchronous>, transform_indices = @transform_1, window_bounds = array<i64: 128, 128>}, {pipeline_mode = #tpu.pipeline_mode<synchronous>, transform_indices = @transform_2, window_bounds = array<i64: 1, 128>}, {pipeline_mode = #tpu.pipeline_mode<synchronous>, transform_indices = @transform_3, window_bounds = array<i64: 128, 128>}, {pipeline_mode = #tpu.pipeline_mode<synchronous>, transform_indices = @transform_4, window_bounds = array<i64: 1, 128>}, {transform_indices = @transform_5, window_bounds = array<i64: 8, 128>}]} {
    %c0 = arith.constant 0 : index
    %c0_0 = arith.constant 0 : index
    %0 = vector.load %arg2[%c0, %c0_0] : memref<8x128xf32, #tpu.memory_space<vmem>>, vector<8x128xf32>
    %c0_1 = arith.constant 0 : index
    %c0_2 = arith.constant 0 : index
    %1 = vector.load %arg3[%c0_1, %c0_2] : memref<128x128xf32, #tpu.memory_space<vmem>>, vector<128x128xf32>
    %cst = arith.constant dense<0.000000e+00> : vector<8x128xf32>
    %2 = tpu.matmul %0, %1, %cst {dimension_numbers = #tpu.dot_dimension_numbers<[1], [0], [0], [1], [0, 0, 1, 1], [], []>} : vector<8x128xf32>, vector<128x128xf32>, vector<8x128xf32> -> vector<8x128xf32>
    %c0_i32 = arith.constant 0 : i32
    %3 = arith.cmpi eq, %arg1, %c0_i32 : i32
    %4 = arith.extui %3 : i1 to i32
    %c0_i32_3 = arith.constant 0 : i32
    %5 = arith.cmpi ne, %4, %c0_i32_3 : i32
    scf.if %5 {
      %c0_8 = arith.constant 0 : index
      %c0_9 = arith.constant 0 : index
      %12 = vector.load %arg8[%c0_8, %c0_9] : memref<8x128xf32, #tpu.memory_space<vmem>>, vector<8x128xf32>
      tpu.vector_store %arg8[%c0_8, %c0_9], %2 {strides = array<i32>} : memref<8x128xf32, #tpu.memory_space<vmem>>, vector<8x128xf32>,
    } else {
    }
    %c0_i32_4 = arith.constant 0 : i32
    %6 = arith.cmpi sgt, %arg1, %c0_i32_4 : i32
    %7 = arith.extui %6 : i1 to i32
    %c0_i32_5 = arith.constant 0 : i32
    %8 = arith.cmpi ne, %7, %c0_i32_5 : i32
    scf.if %8 {
      %c0_8 = arith.constant 0 : index
      %c0_9 = arith.constant 0 : index
      %12 = vector.load %arg8[%c0_8, %c0_9] : memref<8x128xf32, #tpu.memory_space<vmem>>, vector<8x128xf32>
      %13 = arith.addf %12, %2 : vector<8x128xf32>
      %c0_10 = arith.constant 0 : index
      %c0_11 = arith.constant 0 : index
      %14 = vector.load %arg8[%c0_10, %c0_11] : memref<8x128xf32, #tpu.memory_space<vmem>>, vector<8x128xf32>
      tpu.vector_store %arg8[%c0_10, %c0_11], %13 {strides = array<i32>} : memref<8x128xf32, #tpu.memory_space<vmem>>, vector<8x128xf32>,
    } else {
    }
    %c0_i32_6 = arith.constant 0 : i32
    %9 = arith.cmpi eq, %arg1, %c0_i32_6 : i32
    %10 = arith.extui %9 : i1 to i32
    %c0_i32_7 = arith.constant 0 : i32
    %11 = arith.cmpi ne, %10, %c0_i32_7 : i32
    scf.if %11 {
      %c0_8 = arith.constant 0 : index
      %c0_9 = arith.constant 0 : index
      %12 = vector.load %arg8[%c0_8, %c0_9] : memref<8x128xf32, #tpu.memory_space<vmem>>, vector<8x128xf32>
      %c0_10 = arith.constant 0 : index
      %c0_11 = arith.constant 0 : index
      %13 = vector.load %arg4[%c0_10, %c0_11] : memref<1x128xf32, #tpu.memory_space<vmem>>, vector<1x128xf32>
      %14 = vector.broadcast %13 : vector<1x128xf32> to vector<8x128xf32>
      %15 = arith.addf %12, %14 : vector<8x128xf32>
      %cst_12 = arith.constant 0.000000e+00 : f32
      %16 = vector.broadcast %cst_12 : f32 to vector<8x128xf32>
      %17 = arith.maximumf %15, %16 : vector<8x128xf32>
      %c0_13 = arith.constant 0 : index
      %c0_14 = arith.constant 0 : index
      %18 = vector.load %arg5[%c0_13, %c0_14] : memref<128x128xf32, #tpu.memory_space<vmem>>, vector<128x128xf32>
      %cst_15 = arith.constant dense<0.000000e+00> : vector<8x128xf32>
      %19 = tpu.matmul %17, %18, %cst_15 {dimension_numbers = #tpu.dot_dimension_numbers<[1], [0], [0], [1], [0, 0, 1, 1], [], []>} : vector<8x128xf32>, vector<128x128xf32>, vector<8x128xf32> -> vector<8x128xf32>
      %c0_16 = arith.constant 0 : index
      %c0_17 = arith.constant 0 : index
      %20 = vector.load %arg6[%c0_16, %c0_17] : memref<1x128xf32, #tpu.memory_space<vmem>>, vector<1x128xf32>
      %21 = vector.broadcast %20 : vector<1x128xf32> to vector<8x128xf32>
      %22 = arith.addf %19, %21 : vector<8x128xf32>
      %c0_18 = arith.constant 0 : index
      %c0_19 = arith.constant 0 : index
      %23 = vector.load %arg7[%c0_18, %c0_19] : memref<8x128xf32, #tpu.memory_space<vmem>>, vector<8x128xf32>
      tpu.vector_store %arg7[%c0_18, %c0_19], %22 {strides = array<i32>} : memref<8x128xf32, #tpu.memory_space<vmem>>, vector<8x128xf32>,
    } else {
    }
    return
  }
  func.func @transform_0(%arg0: i32, %arg1: i32) -> (i32, i32) {
    %c0_i32 = arith.constant 0 : i32
    return %arg0, %arg1 : i32, i32
  }
  func.func @transform_1(%arg0: i32, %arg1: i32) -> (i32, i32) {
    %c0_i32 = arith.constant 0 : i32
    %c0_i32_0 = arith.constant 0 : i32
    return %arg1, %c0_i32 : i32, i32
  }
  func.func @transform_2(%arg0: i32, %arg1: i32) -> (i32, i32) {
    %c0_i32 = arith.constant 0 : i32
    %c0_i32_0 = arith.constant 0 : i32
    %c0_i32_1 = arith.constant 0 : i32
    return %c0_i32, %c0_i32_0 : i32, i32
  }
  func.func @transform_3(%arg0: i32, %arg1: i32) -> (i32, i32) {
    %c0_i32 = arith.constant 0 : i32
    %c0_i32_0 = arith.constant 0 : i32
    %c0_i32_1 = arith.constant 0 : i32
    return %c0_i32, %c0_i32_0 : i32, i32
  }
  func.func @transform_4(%arg0: i32, %arg1: i32) -> (i32, i32) {
    %c0_i32 = arith.constant 0 : i32
    %c0_i32_0 = arith.constant 0 : i32
    %c0_i32_1 = arith.constant 0 : i32
    return %c0_i32, %c0_i32_0 : i32, i32
  }
  func.func @transform_5(%arg0: i32, %arg1: i32) -> (i32, i32) {
    %c0_i32 = arith.constant 0 : i32
    %c0_i32_0 = arith.constant 0 : i32
    return %arg0, %c0_i32 : i32, i32
  }
}

module attributes {stable_mosaic.version = 11 : i64} {
  func.func @_policy_head_kernel(%arg0: i32, %arg1: i32, %arg2: memref<8x128xf32, #tpu.memory_space<vmem>>, %arg3: memref<128x128xf32, #tpu.memory_space<vmem>>, %arg4: memref<1x128xf32, #tpu.memory_space<vmem>>, %arg5: memref<128x128xf32, #tpu.memory_space<vmem>>, %arg6: memref<1x128xf32, #tpu.memory_space<vmem>>, %arg7: memref<8x128xf32, #tpu.memory_space<vmem>>, %arg8: memref<8x128xf32, #tpu.memory_space<vmem>>) attributes {dimension_semantics = [#tpu.dimension_semantics<parallel>, #tpu.dimension_semantics<arbitrary>], iteration_bounds = array<i64: 1, 1>, scalar_prefetch = 0 : i64, scratch_operands = 1 : i64, tpu.core_type = #tpu.core_type<tc>, window_params = [{transform_indices = @transform_0, window_bounds = array<i64: 8, 128>}, {transform_indices = @transform_1, window_bounds = array<i64: 128, 128>}, {pipeline_mode = #tpu.pipeline_mode<synchronous>, transform_indices = @transform_2, window_bounds = array<i64: 1, 128>}, {pipeline_mode = #tpu.pipeline_mode<synchronous>, transform_indices = @transform_3, window_bounds = array<i64: 128, 128>}, {pipeline_mode = #tpu.pipeline_mode<synchronous>, transform_indices = @transform_4, window_bounds = array<i64: 1, 128>}, {transform_indices = @transform_5, window_bounds = array<i64: 8, 128>}]} {
    %c0 = arith.constant 0 : index
    %c0_0 = arith.constant 0 : index
    %0 = vector.load %arg2[%c0, %c0_0] : memref<8x128xf32, #tpu.memory_space<vmem>>, vector<8x128xf32>
    %c0_1 = arith.constant 0 : index
    %c0_2 = arith.constant 0 : index
    %1 = vector.load %arg3[%c0_1, %c0_2] : memref<128x128xf32, #tpu.memory_space<vmem>>, vector<128x128xf32>
    %cst = arith.constant dense<0.000000e+00> : vector<8x128xf32>
    %2 = tpu.matmul %0, %1, %cst {dimension_numbers = #tpu.dot_dimension_numbers<[1], [0], [0], [1], [0, 0, 1, 1], [], []>} : vector<8x128xf32>, vector<128x128xf32>, vector<8x128xf32> -> vector<8x128xf32>
    %c0_i32 = arith.constant 0 : i32
    %3 = arith.cmpi eq, %arg1, %c0_i32 : i32
    %4 = arith.extui %3 : i1 to i32
    %c0_i32_3 = arith.constant 0 : i32
    %5 = arith.cmpi ne, %4, %c0_i32_3 : i32
    scf.if %5 {
      %c0_8 = arith.constant 0 : index
      %c0_9 = arith.constant 0 : index
      %12 = vector.load %arg8[%c0_8, %c0_9] : memref<8x128xf32, #tpu.memory_space<vmem>>, vector<8x128xf32>
      tpu.vector_store %arg8[%c0_8, %c0_9], %2 {strides = array<i32>} : memref<8x128xf32, #tpu.memory_space<vmem>>, vector<8x128xf32>,
    } else {
    }
    %c0_i32_4 = arith.constant 0 : i32
    %6 = arith.cmpi sgt, %arg1, %c0_i32_4 : i32
    %7 = arith.extui %6 : i1 to i32
    %c0_i32_5 = arith.constant 0 : i32
    %8 = arith.cmpi ne, %7, %c0_i32_5 : i32
    scf.if %8 {
      %c0_8 = arith.constant 0 : index
      %c0_9 = arith.constant 0 : index
      %12 = vector.load %arg8[%c0_8, %c0_9] : memref<8x128xf32, #tpu.memory_space<vmem>>, vector<8x128xf32>
      %13 = arith.addf %12, %2 : vector<8x128xf32>
      %c0_10 = arith.constant 0 : index
      %c0_11 = arith.constant 0 : index
      %14 = vector.load %arg8[%c0_10, %c0_11] : memref<8x128xf32, #tpu.memory_space<vmem>>, vector<8x128xf32>
      tpu.vector_store %arg8[%c0_10, %c0_11], %13 {strides = array<i32>} : memref<8x128xf32, #tpu.memory_space<vmem>>, vector<8x128xf32>,
    } else {
    }
    %c0_i32_6 = arith.constant 0 : i32
    %9 = arith.cmpi eq, %arg1, %c0_i32_6 : i32
    %10 = arith.extui %9 : i1 to i32
    %c0_i32_7 = arith.constant 0 : i32
    %11 = arith.cmpi ne, %10, %c0_i32_7 : i32
    scf.if %11 {
      %c0_8 = arith.constant 0 : index
      %c0_9 = arith.constant 0 : index
      %12 = vector.load %arg8[%c0_8, %c0_9] : memref<8x128xf32, #tpu.memory_space<vmem>>, vector<8x128xf32>
      %c0_10 = arith.constant 0 : index
      %c0_11 = arith.constant 0 : index
      %13 = vector.load %arg4[%c0_10, %c0_11] : memref<1x128xf32, #tpu.memory_space<vmem>>, vector<1x128xf32>
      %14 = vector.broadcast %13 : vector<1x128xf32> to vector<8x128xf32>
      %15 = arith.addf %12, %14 : vector<8x128xf32>
      %cst_12 = arith.constant 0.000000e+00 : f32
      %16 = vector.broadcast %cst_12 : f32 to vector<8x128xf32>
      %17 = arith.maximumf %15, %16 : vector<8x128xf32>
      %c0_13 = arith.constant 0 : index
      %c0_14 = arith.constant 0 : index
      %18 = vector.load %arg5[%c0_13, %c0_14] : memref<128x128xf32, #tpu.memory_space<vmem>>, vector<128x128xf32>
      %cst_15 = arith.constant dense<0.000000e+00> : vector<8x128xf32>
      %19 = tpu.matmul %17, %18, %cst_15 {dimension_numbers = #tpu.dot_dimension_numbers<[1], [0], [0], [1], [0, 0, 1, 1], [], []>} : vector<8x128xf32>, vector<128x128xf32>, vector<8x128xf32> -> vector<8x128xf32>
      %c0_16 = arith.constant 0 : index
      %c0_17 = arith.constant 0 : index
      %20 = vector.load %arg6[%c0_16, %c0_17] : memref<1x128xf32, #tpu.memory_space<vmem>>, vector<1x128xf32>
      %21 = vector.broadcast %20 : vector<1x128xf32> to vector<8x128xf32>
      %22 = arith.addf %19, %21 : vector<8x128xf32>
      %c0_18 = arith.constant 0 : index
      %c0_19 = arith.constant 0 : index
      %23 = vector.load %arg7[%c0_18, %c0_19] : memref<8x128xf32, #tpu.memory_space<vmem>>, vector<8x128xf32>
      tpu.vector_store %arg7[%c0_18, %c0_19], %22 {strides = array<i32>} : memref<8x128xf32, #tpu.memory_space<vmem>>, vector<8x128xf32>,
    } else {
    }
    return
  }
  func.func @transform_0(%arg0: i32, %arg1: i32) -> (i32, i32) {
    %c0_i32 = arith.constant 0 : i32
    return %arg0, %arg1 : i32, i32
  }
  func.func @transform_1(%arg0: i32, %arg1: i32) -> (i32, i32) {
    %c0_i32 = arith.constant 0 : i32
    %c0_i32_0 = arith.constant 0 : i32
    return %arg1, %c0_i32 : i32, i32
  }
  func.func @transform_2(%arg0: i32, %arg1: i32) -> (i32, i32) {
    %c0_i32 = arith.constant 0 : i32
    %c0_i32_0 = arith.constant 0 : i32
    %c0_i32_1 = arith.constant 0 : i32
    return %c0_i32, %c0_i32_0 : i32, i32
  }
  func.func @transform_3(%arg0: i32, %arg1: i32) -> (i32, i32) {
    %c0_i32 = arith.constant 0 : i32
    %c0_i32_0 = arith.constant 0 : i32
    %c0_i32_1 = arith.constant 0 : i32
    return %c0_i32, %c0_i32_0 : i32, i32
  }
  func.func @transform_4(%arg0: i32, %arg1: i32) -> (i32, i32) {
    %c0_i32 = arith.constant 0 : i32
    %c0_i32_0 = arith.constant 0 : i32
    %c0_i32_1 = arith.constant 0 : i32
    return %c0_i32, %c0_i32_0 : i32, i32
  }
  func.func @transform_5(%arg0: i32, %arg1: i32) -> (i32, i32) {
    %c0_i32 = arith.constant 0 : i32
    %c0_i32_0 = arith.constant 0 : i32
    return %arg0, %c0_i32 : i32, i32
  }
}

</mosaic_0001>

<bundles_post_ra>
// kernel: tpu_custom_call.1
= control target key start
LH: loop header
LB: loop body
LE: loop exit
PB: predicated region body
PF: predicated region fallthrough
CT: control target
= control target key end

     0   :  { %10 = vsyncpa [#allocation4], 0  ;;  %s348_s0 = inlined_call_operand.hbm [shape: f32[8,128], index: 0, kind: input, shape index: {}]   ;;  %s349_s1 = inlined_call_operand.hbm [shape: f32[128,128], index: 1, kind: input, shape index: {}]   ;;  %s350_s2 = inlined_call_operand.vmem [shape: f32[1,128], index: 2, kind: input, shape index: {}]   ;;  %s351_s3 = inlined_call_operand.hbm [shape: f32[128,128], index: 3, kind: input, shape index: {}]   ;;  %s352_s4 = inlined_call_operand.vmem [shape: f32[1,128], index: 4, kind: input, shape index: {}]   ;;  %s353_s5 = inlined_call_operand.hbm [shape: f32[8,128], index: 5, kind: output, shape index: {}]  }
   0x1   :  { %11 = vsyncpa [#allocation7], 0  ;;  %s28_s20 = sshll.u32 %s349_s1, 4  ;;  %s29_s20 = int_to_ptr.hbm [resolvable:$true] %s28_s20 }
   0x2   :  { %12 = vsyncpa [#allocation5], 0  ;;  %s294_s21 = smov [#allocation6]   ;;  %s18_s25 = sshll.u32 %s348_s0, 4  ;;  %s19_s25 = int_to_ptr.hbm [resolvable:$true] %s18_s25 }
   0x3   :  { %s30_s22 = sshll.u32 %s294_s21, 4  ;;  %s295_s26 = smov 128   ;;  %s31_s22 = int_to_ptr.vmem [resolvable:$true] %s30_s22 }
   0x4   :  { %s296_s27 = smov 8   ;;  %s297_s28 = smov [#allocation3]  }
   0x5   :  { %36 = dma.hbm_to_vmem [thread:$0]  %s29_s20, 2048, %s31_s22, [#allocation7], %s295_s26, %s295_s26, %s296_s27  }
   0x6   :  { %s20_s29 = sshll.u32 %s297_s28, 4  ;;  %s43_s7 = sshll.u32 %s351_s3, 4  ;;  %s21_s29 = int_to_ptr.vmem [resolvable:$true] %s20_s29  ;;  %s44_s7 = int_to_ptr.hbm [resolvable:$true] %s43_s7 }
   0x7   :  { %23 = dma.hbm_to_vmem [thread:$0]  %s19_s25, 128, %s21_s29, [#allocation4]  }
   0x8   :  { %s298_s1 = smov [#allocation8]  }
   0x9   :  { %s45_s8 = sshll.u32 %s298_s1, 4  ;;  %s46_s8 = int_to_ptr.vmem [resolvable:$true] %s45_s8 }
   0xa   :  { %51 = dma.hbm_to_vmem [thread:$0]  %s44_s7, 2048, %s46_s8, [#allocation7], %s295_s26, %s295_s26, %s296_s27  }
   0xb   :  { %288 = dma.done.wait [#allocation4], 128  }
   0xc   :  { %289 = vsyncadd [#allocation4], 4294967168 }
   0xd   :  { %290 = dma.done.wait [#allocation7], 4096  }
   0xe   :  { %291 = vsyncadd [#allocation7], 4294963200  ;;  %v82_v0 = vld [vmem:[#allocation6 + $0x78] sm:$0xff]  ;;  %v81_v1 = vld [vmem:[#allocation6 + $0x70] sm:$0xff]  ;;  %s299_s11 = smov [#allocation9]   ;;  %s173_s15 = sshll.u32 %s353_s5, 4  ;;  %s174_s15 = int_to_ptr.hbm [resolvable:$true] %s173_s15 }
   0xf   :  { %83 = vmatpush.msra.mxu0 %v82_v0  ;;  %v80_v2 = vld [vmem:[#allocation6 + $0x68] sm:$0xff]  ;;  %v79_v3 = vld [vmem:[#allocation6 + $0x60] sm:$0xff]  ;;  %v140_v4 = vld [vmem:[#allocation8 + $0x78] sm:$0xff]  ;;  %s171_s12 = sshll.u32 %s299_s11, 4  ;;  %s172_s12 = int_to_ptr.vmem [resolvable:$true] %s171_s12 }
  0x10   :  { %v78_v5 = vld [vmem:[#allocation6 + $0x58] sm:$0xff]  ;;  %145 = vmatpush.msra.mxu1 %v140_v4  ;;  %v139_v6 = vld [vmem:[#allocation8 + $0x70] sm:$0xff]  ;;  %v138_v7 = vld [vmem:[#allocation8 + $0x68] sm:$0xff] }
  0x11   :  { %84 = vmatpush.msra.mxu0 %v81_v1  ;;  %v77_v8 = vld [vmem:[#allocation6 + $0x50] sm:$0xff]  ;;  %v137_v9 = vld [vmem:[#allocation8 + $0x60] sm:$0xff]  ;;  %v76_v10 = vld [vmem:[#allocation6 + $0x48] sm:$0xff] }
  0x12   :  { %146 = vmatpush.msra.mxu1 %v139_v6  ;;  %v136_v11 = vld [vmem:[#allocation8 + $0x58] sm:$0xff]  ;;  %v75_v12 = vld [vmem:[#allocation6 + $0x40] sm:$0xff]  ;;  %v135_v13 = vld [vmem:[#allocation8 + $0x50] sm:$0xff] }
  0x13   :  { %85 = vmatpush.msra.mxu0 %v80_v2  ;;  %v74_v14 = vld [vmem:[#allocation6 + $0x38] sm:$0xff]  ;;  %v134_v15 = vld [vmem:[#allocation8 + $0x48] sm:$0xff]  ;;  %v73_v16 = vld [vmem:[#allocation6 + $0x30] sm:$0xff] }
  0x14   :  { %147 = vmatpush.msra.mxu1 %v138_v7  ;;  %v133_v17 = vld [vmem:[#allocation8 + $0x40] sm:$0xff]  ;;  %v72_v18 = vld [vmem:[#allocation6 + $0x28] sm:$0xff]  ;;  %v132_v19 = vld [vmem:[#allocation8 + $0x38] sm:$0xff] }
  0x15   :  { %86 = vmatpush.msra.mxu0 %v79_v3  ;;  %v71_v20 = vld [vmem:[#allocation6 + $0x20] sm:$0xff]  ;;  %v131_v21 = vld [vmem:[#allocation8 + $0x30] sm:$0xff]  ;;  %v70_v22 = vld [vmem:[#allocation6 + $0x18] sm:$0xff] }
  0x16   :  { %148 = vmatpush.msra.mxu1 %v137_v9  ;;  %v130_v23 = vld [vmem:[#allocation8 + $0x28] sm:$0xff]  ;;  %v69_v24 = vld [vmem:[#allocation6 + $0x10] sm:$0xff]  ;;  %v129_v25 = vld [vmem:[#allocation8 + $0x20] sm:$0xff] }
  0x17   :  { %87 = vmatpush.msra.mxu0 %v78_v5  ;;  %v68_v26 = vld [vmem:[#allocation6 + $0x8] sm:$0xff]  ;;  %v128_v27 = vld [vmem:[#allocation8 + $0x18] sm:$0xff]  ;;  %v67_v28 = vld [vmem:[#allocation6] sm:$0xff] }
  0x18   :  { %149 = vmatpush.msra.mxu1 %v136_v11  ;;  %v66_v29 = vld [vmem:[#allocation3] sm:$0xff]  ;;  %v127_v30 = vld [vmem:[#allocation8 + $0x10] sm:$0xff]  ;;  %v126_v31 = vld [vmem:[#allocation8 + $0x8] sm:$0xff] }
  0x19   :  { %88 = vmatpush.msra.mxu0 %v77_v8  ;;  %v125_v32 = vld [vmem:[#allocation8] sm:$0xff]  ;;  %v190_v33 = vld [vmem:[%s350_s2] ss:$0 sm:$0xff] }
  0x1a   :  { %150 = vmatpush.msra.mxu1 %v135_v13  ;;  %v191_v37 = vld [vmem:[%s352_s4] ss:$0 sm:$0xff] }
  0x1b   :  { %89 = vmatpush.msra.mxu0 %v76_v10 }
  0x1c   :  { %151 = vmatpush.msra.mxu1 %v134_v15 }
  0x1d   :  { %90 = vmatpush.msra.mxu0 %v75_v12 }
  0x1e   :  { %152 = vmatpush.msra.mxu1 %v133_v17 }
  0x1f   :  { %91 = vmatpush.msra.mxu0 %v74_v14 }
  0x20   :  { %153 = vmatpush.msra.mxu1 %v132_v19 }
  0x21   :  { %92 = vmatpush.msra.mxu0 %v73_v16 }
  0x22   :  { %154 = vmatpush.msra.mxu1 %v131_v21 }
  0x23   :  { %93 = vmatpush.msra.mxu0 %v72_v18 }
  0x24   :  { %155 = vmatpush.msra.mxu1 %v130_v23 }
  0x25   :  { %94 = vmatpush.msra.mxu0 %v71_v20 }
  0x26   :  { %156 = vmatpush.msra.mxu1 %v129_v25 }
  0x27   :  { %95 = vmatpush.msra.mxu0 %v70_v22 }
  0x28   :  { %157 = vmatpush.msra.mxu1 %v128_v27 }
  0x29   :  { %96 = vmatpush.msra.mxu0 %v69_v24 }
  0x2a   :  { %158 = vmatpush.msra.mxu1 %v127_v30 }
  0x2b   :  { %97 = vmatpush.msra.mxu0 %v68_v26 }
  0x2c   :  { %159 = vmatpush.msra.mxu1 %v126_v31 }
  0x2d   :  { %98 = vmatpush.msra.mxu0 %v67_v28 }
  0x2e   :  { %99 = vmatmul.f32.vlgmr.msra.gmra.mxu0 %v66_v29  ;;  %160 = vmatpush.msra.mxu1 %v125_v32 }
  0xab   :  { %v100_v34 = vpop.f32.mrf.mxu0 }
  0xac   :  { %v123_v35 = vadd.f32 %v190_v33, %v100_v34 }
  0xae   :  { %v124_v36 = vmax.f32 %v123_v35, 0.0 }
  0xb0   :  { %161 = vmatmul.f32.vlgmr.msra.gmra.mxu1 %v124_v36 }
 0x12d   :  { %v162_v38 = vpop.f32.mrf.mxu1 }
 0x12e   :  { %v163_v39 = vadd.f32 %v191_v37, %v162_v38 }
 0x130   :  { %165 = vst [vmem:[#allocation9] sm:$0xff] %v163_v39 }
 0x131   :  { %176 = dma.vmem_to_hbm [thread:$0]  %s172_s12, 128, %s174_s15, [#allocation5]  }
 0x132   :  { %292 = dma.done.wait [#allocation5], 128  }
 0x133   :  { %293 = vsyncadd [#allocation5], 4294967168 }
 0x134   :  { %181 = vsyncpa [#allocation4], 1 }
 0x135   :  { %182 = vsyncpa [#allocation7], 1 }
 0x136   :  { %183 = vsyncpa [#allocation5], 1 }

// kernel: tpu_custom_call.1
= control target key start
LH: loop header
LB: loop body
LE: loop exit
PB: predicated region body
PF: predicated region fallthrough
CT: control target
= control target key end

     0   :  { %10 = vsyncpa [#allocation4], 0  ;;  %s348_s0 = inlined_call_operand.hbm [shape: f32[8,128], index: 0, kind: input, shape index: {}]   ;;  %s349_s1 = inlined_call_operand.hbm [shape: f32[128,128], index: 1, kind: input, shape index: {}]   ;;  %s350_s2 = inlined_call_operand.vmem [shape: f32[1,128], index: 2, kind: input, shape index: {}]   ;;  %s351_s3 = inlined_call_operand.hbm [shape: f32[128,128], index: 3, kind: input, shape index: {}]   ;;  %s352_s4 = inlined_call_operand.vmem [shape: f32[1,128], index: 4, kind: input, shape index: {}]   ;;  %s353_s5 = inlined_call_operand.hbm [shape: f32[8,128], index: 5, kind: output, shape index: {}]  }
   0x1   :  { %11 = vsyncpa [#allocation7], 0  ;;  %s28_s20 = sshll.u32 %s349_s1, 4  ;;  %s29_s20 = int_to_ptr.hbm [resolvable:$true] %s28_s20 }
   0x2   :  { %12 = vsyncpa [#allocation5], 0  ;;  %s294_s21 = smov [#allocation6]   ;;  %s18_s25 = sshll.u32 %s348_s0, 4  ;;  %s19_s25 = int_to_ptr.hbm [resolvable:$true] %s18_s25 }
   0x3   :  { %s30_s22 = sshll.u32 %s294_s21, 4  ;;  %s295_s26 = smov 128   ;;  %s31_s22 = int_to_ptr.vmem [resolvable:$true] %s30_s22 }
   0x4   :  { %s296_s27 = smov 8   ;;  %s297_s28 = smov [#allocation3]  }
   0x5   :  { %36 = dma.hbm_to_vmem [thread:$0]  %s29_s20, 2048, %s31_s22, [#allocation7], %s295_s26, %s295_s26, %s296_s27  }
   0x6   :  { %s20_s29 = sshll.u32 %s297_s28, 4  ;;  %s43_s7 = sshll.u32 %s351_s3, 4  ;;  %s21_s29 = int_to_ptr.vmem [resolvable:$true] %s20_s29  ;;  %s44_s7 = int_to_ptr.hbm [resolvable:$true] %s43_s7 }
   0x7   :  { %23 = dma.hbm_to_vmem [thread:$0]  %s19_s25, 128, %s21_s29, [#allocation4]  }
   0x8   :  { %s298_s1 = smov [#allocation8]  }
   0x9   :  { %s45_s8 = sshll.u32 %s298_s1, 4  ;;  %s46_s8 = int_to_ptr.vmem [resolvable:$true] %s45_s8 }
   0xa   :  { %51 = dma.hbm_to_vmem [thread:$0]  %s44_s7, 2048, %s46_s8, [#allocation7], %s295_s26, %s295_s26, %s296_s27  }
   0xb   :  { %288 = dma.done.wait [#allocation4], 128  }
   0xc   :  { %289 = vsyncadd [#allocation4], 4294967168 }
   0xd   :  { %290 = dma.done.wait [#allocation7], 4096  }
   0xe   :  { %291 = vsyncadd [#allocation7], 4294963200  ;;  %v82_v0 = vld [vmem:[#allocation6 + $0x78] sm:$0xff]  ;;  %v81_v1 = vld [vmem:[#allocation6 + $0x70] sm:$0xff]  ;;  %s299_s11 = smov [#allocation9]   ;;  %s173_s15 = sshll.u32 %s353_s5, 4  ;;  %s174_s15 = int_to_ptr.hbm [resolvable:$true] %s173_s15 }
   0xf   :  { %83 = vmatpush.msra.mxu0 %v82_v0  ;;  %v80_v2 = vld [vmem:[#allocation6 + $0x68] sm:$0xff]  ;;  %v79_v3 = vld [vmem:[#allocation6 + $0x60] sm:$0xff]  ;;  %v140_v4 = vld [vmem:[#allocation8 + $0x78] sm:$0xff]  ;;  %s171_s12 = sshll.u32 %s299_s11, 4  ;;  %s172_s12 = int_to_ptr.vmem [resolvable:$true] %s171_s12 }
  0x10   :  { %v78_v5 = vld [vmem:[#allocation6 + $0x58] sm:$0xff]  ;;  %145 = vmatpush.msra.mxu1 %v140_v4  ;;  %v139_v6 = vld [vmem:[#allocation8 + $0x70] sm:$0xff]  ;;  %v138_v7 = vld [vmem:[#allocation8 + $0x68] sm:$0xff] }
  0x11   :  { %84 = vmatpush.msra.mxu0 %v81_v1  ;;  %v77_v8 = vld [vmem:[#allocation6 + $0x50] sm:$0xff]  ;;  %v137_v9 = vld [vmem:[#allocation8 + $0x60] sm:$0xff]  ;;  %v76_v10 = vld [vmem:[#allocation6 + $0x48] sm:$0xff] }
  0x12   :  { %146 = vmatpush.msra.mxu1 %v139_v6  ;;  %v136_v11 = vld [vmem:[#allocation8 + $0x58] sm:$0xff]  ;;  %v75_v12 = vld [vmem:[#allocation6 + $0x40] sm:$0xff]  ;;  %v135_v13 = vld [vmem:[#allocation8 + $0x50] sm:$0xff] }
  0x13   :  { %85 = vmatpush.msra.mxu0 %v80_v2  ;;  %v74_v14 = vld [vmem:[#allocation6 + $0x38] sm:$0xff]  ;;  %v134_v15 = vld [vmem:[#allocation8 + $0x48] sm:$0xff]  ;;  %v73_v16 = vld [vmem:[#allocation6 + $0x30] sm:$0xff] }
  0x14   :  { %147 = vmatpush.msra.mxu1 %v138_v7  ;;  %v133_v17 = vld [vmem:[#allocation8 + $0x40] sm:$0xff]  ;;  %v72_v18 = vld [vmem:[#allocation6 + $0x28] sm:$0xff]  ;;  %v132_v19 = vld [vmem:[#allocation8 + $0x38] sm:$0xff] }
  0x15   :  { %86 = vmatpush.msra.mxu0 %v79_v3  ;;  %v71_v20 = vld [vmem:[#allocation6 + $0x20] sm:$0xff]  ;;  %v131_v21 = vld [vmem:[#allocation8 + $0x30] sm:$0xff]  ;;  %v70_v22 = vld [vmem:[#allocation6 + $0x18] sm:$0xff] }
  0x16   :  { %148 = vmatpush.msra.mxu1 %v137_v9  ;;  %v130_v23 = vld [vmem:[#allocation8 + $0x28] sm:$0xff]  ;;  %v69_v24 = vld [vmem:[#allocation6 + $0x10] sm:$0xff]  ;;  %v129_v25 = vld [vmem:[#allocation8 + $0x20] sm:$0xff] }
  0x17   :  { %87 = vmatpush.msra.mxu0 %v78_v5  ;;  %v68_v26 = vld [vmem:[#allocation6 + $0x8] sm:$0xff]  ;;  %v128_v27 = vld [vmem:[#allocation8 + $0x18] sm:$0xff]  ;;  %v67_v28 = vld [vmem:[#allocation6] sm:$0xff] }
  0x18   :  { %149 = vmatpush.msra.mxu1 %v136_v11  ;;  %v66_v29 = vld [vmem:[#allocation3] sm:$0xff]  ;;  %v127_v30 = vld [vmem:[#allocation8 + $0x10] sm:$0xff]  ;;  %v126_v31 = vld [vmem:[#allocation8 + $0x8] sm:$0xff] }
  0x19   :  { %88 = vmatpush.msra.mxu0 %v77_v8  ;;  %v125_v32 = vld [vmem:[#allocation8] sm:$0xff]  ;;  %v190_v33 = vld [vmem:[%s350_s2] ss:$0 sm:$0xff] }
  0x1a   :  { %150 = vmatpush.msra.mxu1 %v135_v13  ;;  %v191_v37 = vld [vmem:[%s352_s4] ss:$0 sm:$0xff] }
  0x1b   :  { %89 = vmatpush.msra.mxu0 %v76_v10 }
  0x1c   :  { %151 = vmatpush.msra.mxu1 %v134_v15 }
  0x1d   :  { %90 = vmatpush.msra.mxu0 %v75_v12 }
  0x1e   :  { %152 = vmatpush.msra.mxu1 %v133_v17 }
  0x1f   :  { %91 = vmatpush.msra.mxu0 %v74_v14 }
  0x20   :  { %153 = vmatpush.msra.mxu1 %v132_v19 }
  0x21   :  { %92 = vmatpush.msra.mxu0 %v73_v16 }
  0x22   :  { %154 = vmatpush.msra.mxu1 %v131_v21 }
  0x23   :  { %93 = vmatpush.msra.mxu0 %v72_v18 }
  0x24   :  { %155 = vmatpush.msra.mxu1 %v130_v23 }
  0x25   :  { %94 = vmatpush.msra.mxu0 %v71_v20 }
  0x26   :  { %156 = vmatpush.msra.mxu1 %v129_v25 }
  0x27   :  { %95 = vmatpush.msra.mxu0 %v70_v22 }
  0x28   :  { %157 = vmatpush.msra.mxu1 %v128_v27 }
  0x29   :  { %96 = vmatpush.msra.mxu0 %v69_v24 }
  0x2a   :  { %158 = vmatpush.msra.mxu1 %v127_v30 }
  0x2b   :  { %97 = vmatpush.msra.mxu0 %v68_v26 }
  0x2c   :  { %159 = vmatpush.msra.mxu1 %v126_v31 }
  0x2d   :  { %98 = vmatpush.msra.mxu0 %v67_v28 }
  0x2e   :  { %99 = vmatmul.f32.vlgmr.msra.gmra.mxu0 %v66_v29  ;;  %160 = vmatpush.msra.mxu1 %v125_v32 }
  0xab   :  { %v100_v34 = vpop.f32.mrf.mxu0 }
  0xac   :  { %v123_v35 = vadd.f32 %v190_v33, %v100_v34 }
  0xae   :  { %v124_v36 = vmax.f32 %v123_v35, 0.0 }
  0xb0   :  { %161 = vmatmul.f32.vlgmr.msra.gmra.mxu1 %v124_v36 }
 0x12d   :  { %v162_v38 = vpop.f32.mrf.mxu1 }
 0x12e   :  { %v163_v39 = vadd.f32 %v191_v37, %v162_v38 }
 0x130   :  { %165 = vst [vmem:[#allocation9] sm:$0xff] %v163_v39 }
 0x131   :  { %176 = dma.vmem_to_hbm [thread:$0]  %s172_s12, 128, %s174_s15, [#allocation5]  }
 0x132   :  { %292 = dma.done.wait [#allocation5], 128  }
 0x133   :  { %293 = vsyncadd [#allocation5], 4294967168 }
 0x134   :  { %181 = vsyncpa [#allocation4], 1 }
 0x135   :  { %182 = vsyncpa [#allocation7], 1 }
 0x136   :  { %183 = vsyncpa [#allocation5], 1 }

</bundles_post_ra>
